<compile_context>
chip_gen: v6e
topology: v6e:2x2x1
jax: 0.10.0
libtpu: 0.0.40
codegen_flags: <defaults>
</compile_context>

<pallas_src>
import functools

import jax
import jax.numpy as jnp
from jax.experimental import pallas as pl
from jax.experimental.pallas import tpu as pltpu

_MIB = 1024 * 1024


def _round_up(x: int, m: int) -> int:
    return ((x + m - 1) // m) * m


def _vmem_capacity_bytes() -> int:
    """Physical VMEM per TensorCore; conservative 64 MiB (v7x) fallback."""
    try:
        info = pltpu.get_tpu_info()
        cap = int(getattr(info, "vmem_capacity_bytes", 0) or 0)
        if cap > 0:
            return cap
    except Exception:
        pass
    return 64 * _MIB


# ---------------------------------------------------------------------------
# Fused single-pass kernel (full D in one lane-dense block)
# ---------------------------------------------------------------------------
def _rmsnorm_kernel(x_ref, w_ref, o_ref, *, eps: float):
    # x_ref: (tm, D) tile; w_ref: (1, D); o_ref: (tm, D)
    x = x_ref[...].astype(jnp.float32)                    # upcast for reduce
    ms = jnp.mean(x * x, axis=-1, keepdims=True)          # (tm, 1) XLU reduce
    inv = jax.lax.rsqrt(ms + eps)                         # EUP, ~free slot
    w = w_ref[...].astype(jnp.float32)                    # (1, D) broadcasts
    # Re-read / re-upcast x_ref instead of reusing `x` so the f32 copy is not
    # held live across the reduction (smaller VMEM/vreg footprint).
    o_ref[...] = (x_ref[...].astype(jnp.float32) * inv * w).astype(o_ref.dtype)


# ---------------------------------------------------------------------------
# Two-pass fallback for very large D: (1) per-row 1/rms, (2) apply
# ---------------------------------------------------------------------------
def _rms_stats_kernel(x_ref, inv_ref, *, eps: float, d_total: int):
    k = pl.program_id(1)

    @pl.when(k == 0)
    def _():
        inv_ref[...] = jnp.zeros_like(inv_ref)

    x = x_ref[...].astype(jnp.float32)                    # (tm, td)
    td = x.shape[-1]
    lane = jax.lax.broadcasted_iota(jnp.int32, x.shape, dimension=1)
    valid = (k * td + lane) < d_total                     # mask ragged D block
    inv_ref[...] += jnp.sum(jnp.where(valid, x * x, 0.0), axis=-1, keepdims=True)

    @pl.when(k == pl.num_programs(1) - 1)
    def _():
        inv_ref[...] = jax.lax.rsqrt(inv_ref[...] * (1.0 / d_total) + eps)


def _rms_apply_kernel(x_ref, w_ref, inv_ref, o_ref):
    x = x_ref[...].astype(jnp.float32)
    w = w_ref[...].astype(jnp.float32)
    o_ref[...] = (x * inv_ref[...] * w).astype(o_ref.dtype)


# ---------------------------------------------------------------------------
# Wrapper
# ---------------------------------------------------------------------------
def rms_norm(x: jax.Array, weight: jax.Array, eps: float = 1e-6,
             tm: int | None = None, d_block: int | None = None) -> jax.Array:
    """Matches torch RMSNorm.forward: x / sqrt(mean(x^2,-1)+eps) * weight."""
    *lead, d = x.shape
    assert weight.shape == (d,), "weight must have shape (dim,)"

    x2d = x.reshape(-1, d)
    m = x2d.shape[0]
    itemsize = jnp.dtype(x.dtype).itemsize
    w_itemsize = jnp.dtype(weight.dtype).itemsize
    w2d = weight.reshape(1, d)

    # dtype-aware sublane multiple: 8 for f32, 16 for bf16, 32 for int8/fp8
    sub = {4: 8, 2: 16, 1: 32}.get(itemsize, 8)

    # Generation-aware VMEM accounting.  Budget covers 2x in + 2x out buffers
    # plus the f32 working set of the reduce; vmem_limit_bytes raised above
    # the scoped defaults (16/32 MiB) but kept well inside physical VMEM
    # (64 MiB on v7x, 128 MiB on v5e/v6e).
    cap = _vmem_capacity_bytes()
    budget = min(int(cap * 0.5), 40 * _MIB)
    vmem_limit = min(int(cap * 0.75), 96 * _MIB)

    per_row = 2 * d * itemsize + 2 * d * itemsize + 4 * d   # 2x in, 2x out, f32
    rows_fit = budget // max(per_row, 1)

    use_split = (d_block is not None) or (rows_fit < sub and d > 128)

    if not use_split:
        # ----- fused single-pass path -----
        if tm is None:
            tm = max(sub, min(4096, int(rows_fit)))
        tm = max(sub, (min(tm, _round_up(m, sub)) // sub) * sub)
        # >= 2 row blocks whenever possible so the "parallel" axis can be
        # split across both TensorCores on v7x (neutral on v5e/v6e).
        if m > sub:
            tm = min(tm, _round_up((m + 1) // 2, sub))
        tm = max(sub, (tm // sub) * sub)

        grid = (pl.cdiv(m, tm),)   # ragged last row block is masked
        out2d = pl.pallas_call(
            functools.partial(_rmsnorm_kernel, eps=float(eps)),
            out_shape=jax.ShapeDtypeStruct((m, d), x.dtype),
            grid_spec=pltpu.PrefetchScalarGridSpec(
                num_scalar_prefetch=0,
                grid=grid,
                in_specs=[
                    pl.BlockSpec((tm, d), lambda i: (i, 0)),   # activations
                    pl.BlockSpec((1, d), lambda i: (0, 0)),    # weight (resident)
                ],
                out_specs=pl.BlockSpec((tm, d), lambda i: (i, 0)),
            ),
            compiler_params=pltpu.CompilerParams(
                dimension_semantics=("parallel",),
                vmem_limit_bytes=vmem_limit,
            ),
            cost_estimate=pl.CostEstimate(
                flops=3 * m * d,
                transcendentals=m,
                bytes_accessed=2 * m * d * itemsize + d * w_itemsize,
            ),
        )(x2d, w2d)
        return out2d.reshape(*lead, d)

    # ----- two-pass D-split fallback (or forced via d_block for testing) -----
    if tm is None:
        tm = 1024
    tm = max(sub, (min(tm, _round_up(m, sub)) // sub) * sub)
    if m > sub:
        tm = min(tm, _round_up((m + 1) // 2, sub))
    tm = max(sub, (tm // sub) * sub)

    if d_block is None:
        per_elem = 4 * itemsize + 4            # 2x in, 2x out, f32 temp
        td = max(128, (budget // max(tm * per_elem, 1)) // 128 * 128)
    else:
        td = d_block
    td = max(128, min(td, _round_up(d, 128)))
    nd = pl.cdiv(d, td)
    nm = pl.cdiv(m, tm)

    # Pass 1: per-row 1/rms (accumulate sum of squares across D blocks).
    inv = pl.pallas_call(
        functools.partial(_rms_stats_kernel, eps=float(eps), d_total=d),
        out_shape=jax.ShapeDtypeStruct((m, 1), jnp.float32),
        grid_spec=pltpu.PrefetchScalarGridSpec(
            num_scalar_prefetch=0,
            grid=(nm, nd),
            in_specs=[pl.BlockSpec((tm, td), lambda i, k: (i, k))],
            out_specs=pl.BlockSpec((tm, 1), lambda i, k: (i, 0)),
        ),
        compiler_params=pltpu.CompilerParams(
            dimension_semantics=("parallel", "arbitrary"),
            vmem_limit_bytes=vmem_limit,
        ),
        cost_estimate=pl.CostEstimate(
            flops=2 * m * d,
            transcendentals=m,
            bytes_accessed=m * d * itemsize + m * 4,
        ),
    )(x2d)

    # Pass 2: apply x * inv_rms * w.
    out2d = pl.pallas_call(
        _rms_apply_kernel,
        out_shape=jax.ShapeDtypeStruct((m, d), x.dtype),
        grid_spec=pltpu.PrefetchScalarGridSpec(
            num_scalar_prefetch=0,
            grid=(nm, nd),
            in_specs=[
                pl.BlockSpec((tm, td), lambda i, k: (i, k)),
                pl.BlockSpec((1, td), lambda i, k: (0, k)),
                pl.BlockSpec((tm, 1), lambda i, k: (i, 0)),
            ],
            out_specs=pl.BlockSpec((tm, td), lambda i, k: (i, k)),
        ),
        compiler_params=pltpu.CompilerParams(
            dimension_semantics=("parallel", "arbitrary"),
            vmem_limit_bytes=vmem_limit,
        ),
        cost_estimate=pl.CostEstimate(
            flops=2 * m * d,
            transcendentals=0,
            bytes_accessed=2 * m * d * itemsize + d * w_itemsize + m * 4,
        ),
    )(x2d, w2d, inv)
    return out2d.reshape(*lead, d)


def _ref_rmsnorm(x, w, eps=1e-6):
    xf = x.astype(jnp.float32)
    rms = jnp.sqrt(jnp.mean(xf ** 2, axis=-1, keepdims=True) + eps)
    return (xf / rms * w.astype(jnp.float32)).astype(x.dtype)


if __name__ == "__main__":
    key = jax.random.PRNGKey(0)
    k1, k2, k3, k4 = jax.random.split(key, 4)

    dim = 256
    w = 1.0 + 0.1 * jax.random.normal(k2, (dim,), dtype=jnp.float32)

    # 1) batch=2, seq=8, dim=256 — fused path, lane-dense full-D block.
    x = jax.random.normal(k1, (2, 8, dim), dtype=jnp.float32)
    out = rms_norm(x, w)
    jax.block_until_ready(out)
    ref = _ref_rmsnorm(x, w)
    assert out.shape == ref.shape
    assert jnp.allclose(out, ref, atol=1e-5, rtol=1e-5), "mismatch vs reference"

    # 2) ragged row count (21 rows) exercises masked last-block writeback.
    x2 = jax.random.normal(k3, (3, 7, dim), dtype=jnp.float32)
    out2 = rms_norm(x2, w)
    jax.block_until_ready(out2)
    ref2 = _ref_rmsnorm(x2, w)
    assert jnp.allclose(out2, ref2, atol=1e-5, rtol=1e-5), "ragged mismatch"

    # 3) force the two-pass D-split fallback (d_block=128) on the same data.
    out3 = rms_norm(x, w, d_block=128)
    jax.block_until_ready(out3)
    assert jnp.allclose(out3, ref, atol=1e-5, rtol=1e-5), "split-path mismatch"

    # 4) bf16 activations exercise the 16-sublane tiling and single downcast.
    xb = jax.random.normal(k4, (4, 32, dim), dtype=jnp.bfloat16)
    outb = rms_norm(xb, w)
    jax.block_until_ready(outb)
    refb = _ref_rmsnorm(xb, w)
    assert jnp.allclose(outb.astype(jnp.float32), refb.astype(jnp.float32),
                        atol=2e-2, rtol=2e-2), "bf16 mismatch"

    print("KERNEL_OK")
</pallas_src>

<mosaic_0001>
module attributes {stable_mosaic.version = 11 : i64} {
  func.func @_rmsnorm_kernel(%arg0: i32, %arg1: memref<8x256xf32, #tpu.memory_space<vmem>>, %arg2: memref<1x256xf32, #tpu.memory_space<vmem>>, %arg3: memref<8x256xf32, #tpu.memory_space<vmem>>) attributes {dimension_semantics = [#tpu.dimension_semantics<parallel>], iteration_bounds = array<i64: 2>, scalar_prefetch = 0 : i64, scratch_operands = 0 : i64, tpu.core_type = #tpu.core_type<tc>, window_params = [{transform_indices = @transform_0, window_bounds = array<i64: 8, 256>}, {pipeline_mode = #tpu.pipeline_mode<synchronous>, transform_indices = @transform_1, window_bounds = array<i64: 1, 256>}, {transform_indices = @transform_2, window_bounds = array<i64: 8, 256>}]} {
    %c0 = arith.constant 0 : index
    %c0_0 = arith.constant 0 : index
    %0 = vector.load %arg1[%c0, %c0_0] : memref<8x256xf32, #tpu.memory_space<vmem>>, vector<8x256xf32>
    %1 = arith.mulf %0, %0 : vector<8x256xf32>
    %cst = arith.constant dense<0.000000e+00> : vector<8xf32>
    %2 = vector.multi_reduction <add>, %1, %cst [1] : vector<8x256xf32> to vector<8xf32>
    %3 = vector.shape_cast %2 : vector<8xf32> to vector<8x1xf32>
    %cst_1 = arith.constant 2.560000e+02 : f32
    %4 = vector.broadcast %cst_1 : f32 to vector<8x1xf32>
    %5 = arith.divf %3, %4 : vector<8x1xf32>
    %cst_2 = arith.constant 9.99999997E-7 : f32
    %6 = vector.broadcast %cst_2 : f32 to vector<8x1xf32>
    %7 = arith.addf %5, %6 : vector<8x1xf32>
    %8 = math.rsqrt %7 : vector<8x1xf32>
    %c0_3 = arith.constant 0 : index
    %c0_4 = arith.constant 0 : index
    %9 = vector.load %arg2[%c0_3, %c0_4] : memref<1x256xf32, #tpu.memory_space<vmem>>, vector<1x256xf32>
    %c0_5 = arith.constant 0 : index
    %c0_6 = arith.constant 0 : index
    %10 = vector.load %arg1[%c0_5, %c0_6] : memref<8x256xf32, #tpu.memory_space<vmem>>, vector<8x256xf32>
    %11 = vector.broadcast %8 : vector<8x1xf32> to vector<8x256xf32>
    %12 = arith.mulf %10, %11 : vector<8x256xf32>
    %13 = vector.broadcast %9 : vector<1x256xf32> to vector<8x256xf32>
    %14 = arith.mulf %12, %13 : vector<8x256xf32>
    %c0_7 = arith.constant 0 : index
    %c0_8 = arith.constant 0 : index
    %15 = vector.load %arg3[%c0_7, %c0_8] : memref<8x256xf32, #tpu.memory_space<vmem>>, vector<8x256xf32>
    tpu.vector_store %arg3[%c0_7, %c0_8], %14 {strides = array<i32>} : memref<8x256xf32, #tpu.memory_space<vmem>>, vector<8x256xf32>,
    return
  }
  func.func @transform_0(%arg0: i32) -> (i32, i32) {
    %c0_i32 = arith.constant 0 : i32
    %c0_i32_0 = arith.constant 0 : i32
    return %arg0, %c0_i32 : i32, i32
  }
  func.func @transform_1(%arg0: i32) -> (i32, i32) {
    %c0_i32 = arith.constant 0 : i32
    %c0_i32_0 = arith.constant 0 : i32
    %c0_i32_1 = arith.constant 0 : i32
    return %c0_i32, %c0_i32_0 : i32, i32
  }
  func.func @transform_2(%arg0: i32) -> (i32, i32) {
    %c0_i32 = arith.constant 0 : i32
    %c0_i32_0 = arith.constant 0 : i32
    return %arg0, %c0_i32 : i32, i32
  }
}

</mosaic_0001>

<bundles_post_ra>
// kernel: tpu_custom_call.1
= control target key start
LH: loop header
LB: loop body
LE: loop exit
PB: predicated region body
PF: predicated region fallthrough
CT: control target
= control target key end

     0   :  { %7 = vsyncpa [#allocation3], 0  ;;  %s688_s0 = inlined_call_operand.hbm [shape: f32[16,256], index: 0, kind: input, shape index: {}]   ;;  %s689_s1 = inlined_call_operand.hbm [shape: f32[1,256], index: 1, kind: input, shape index: {}]   ;;  %s690_s2 = inlined_call_operand.hbm [shape: f32[16,256], index: 2, kind: output, shape index: {}]  }
   0x1   :  { %9 = vsyncpa [#allocation3 + $0x1], 0 }
   0x2   :  { %10 = vsyncpa [#allocation6], 0 }
   0x3   :  { %11 = vsyncpa [#allocation4], 0 }
   0x4   :  { %13 = vsyncpa [#allocation4 + $0x1], 0  ;;  %s516_s9 = smov 0   ;;  %s518_s10 = smov 0  }
   0x5   :  { %s520_s11 = smov 0   ;;  %s522_s12 = smov 0  }
   0x6 LB: > { %s537_s13 = sadd.s32 4294967295, %s496_s12   ;;  %s297_s14 = sadd.s32 4294967294, %s496_s12   ;;  %s496_s12 = sphi %s522_s12, %s713_s12   ;;  %s492_s11 = sphi %s520_s11, %s712_s11   ;;  %s488_s10 = sphi %s518_s10, %s711_s10   ;;  %s484_s9 = sphi %s516_s9, %s710_s9  }
   0x7   : > { %p39_p0 = scmp.ne.s32.totalorder %s488_s10, %s484_s9  ;;  %p691_p1 = scmp.eq.s32.totalorder %s537_s13, 0 }
   0x8   : > { %p90_p3 = scmp.eq.s32.totalorder %s297_s14, 1  ;;  %p298_p5 = scmp.ge.s32.totalorder %s496_s12, 1 }
   0x9   : > { %p546_p4 = por %p691_p1, %p39_p0  ;;  %p97_p7 = scmp.lt.s32.totalorder %s496_s12, 3 }
   0xa   : > { %p551_p6 = por %p90_p3, %p39_p0  ;;  %s498_s18 = smov [#allocation5]  }
   0xb   : > { %s695_s15 = scalar_select %p546_p4, 1, 0 }
   0xc   : > { %s696_s16 = scalar_select %p551_p6, 1, 0 }
   0xd   : > { %p556_p8 = pnand %p298_p5, %p97_p7  ;;  %s110_s19 = sshll.u32 %s498_s18, 4  ;;  %s111_s19 = int_to_ptr.vmem [resolvable:$true] %s110_s19 }
   0xe   : > { %s564_s20 = sadd.s32 1, %s496_s12   ;;  %s26_s24 = sadd.s32 1, %s492_s11 }
   0xf   : > { %s697_s17 = scalar_select %p556_p8, 1, 0 }
  0x10   : > { %p323_p10 = pneg %p556_p8  ;;  %s23_s22 = ssub.s32 %s496_s12, %s564_s20 }
  0x11   : > { %p574_p12 = scmp.eq.s32.totalorder %s23_s22, 0  ;;  %p33_p13 = scmp.ne.s32.totalorder %s492_s11, %s488_s10 }
  0x12   : > { %p568_p11 = pnand %p323_p10, %p691_p1  ;;  %s385_s25 = scalar_lea.vmem %s111_s19, 32 }
  0x13   : > { %p386_p3 = scmp.ne.s32.totalorder %s111_s19, %s385_s25  ;;  %p393_p9 = scmp.lt.s32.totalorder %s111_s19, %s111_s19 }
  0x14   : > { %p376_p0 = pneg %p568_p11  ;;  %p394_p2 = scmp.lt.s32.totalorder %s385_s25, %s385_s25 }
  0x16   : > { %p388_p5 = pnand %p386_p3, %p376_p0  ;;  %p395_p10 = por %p394_p2, %p393_p9 }
  0x18   : > { %p389_p7 = pneg %p388_p5 }
  0x1a   : > { %p396_p1 = pnand %p395_p10, %p389_p7 }
  0x1c   : > { %399 = shalt.err (!%p396_p1)
}
  0x1d   : > { %326 = dma.hbm_to_vmem [thread:$0]  (!%p568_p11), %s689_s1, 32, %s111_s19, [#allocation6]  }
  0x1e   : > { %s591_s28 = scalar_select %p574_p12, %s492_s11, %s26_s24  }
  0x1f   : > { %p34_p1 = scmp.eq.s32.totalorder %s496_s12, 0  ;;  %p700_p2 = scmp.eq.s32.totalorder %s537_s13, 1 }
  0x20   : > { %p336_p0 = scmp.lt.s32.totalorder %s496_s12, 2  ;;  %s121_s30 = sand.u32 1, %s492_s11  }
  0x21   : > { %p599_p9 = por %p700_p2, %p33_p13  ;;  %p35_p3 = por %p34_p1, %p33_p13 }
  0x22   : > { %s301_s3 = sshll.u32 %s121_s30, 4  ;;  %s313_s4 = sshll.u32 %s496_s12, 8 }
  0x23   : > { %s701_s29 = scalar_select %p599_p9, 1, 0 }
  0x24   : > { %s612_s7 = scalar_lea.hbm %s688_s0, %s313_s4  ;;  %s125_s8 = scalar_lea.vmem [#allocation2], %s301_s3 }
  0x25   : > { %s133_s14 = sshll.u32 %s125_s8, 4  ;;  %p614_p11 = pnand %p336_p0, %p35_p3  ;;  %s134_s14 = int_to_ptr.vmem [resolvable:$true] %s133_s14 }
  0x26   : > { %s122_s19 = scalar_lea.sflag [#allocation3], %s121_s30  ;;  %s400_s21 = scalar_lea.hbm %s612_s7, 256 }
  0x27   : > { %p401_p12 = scmp.ne.s32.totalorder %s612_s7, %s400_s21  ;;  %p402_p13 = pneg %p614_p11 }
  0x28   : > { %s405_s24 = scalar_lea.hbm %s688_s0, 512  ;;  %p406_p10 = scmp.lt.s32.totalorder %s612_s7, %s688_s0 }
  0x29   : > { %p403_p5 = pnand %p402_p13, %p401_p12  ;;  %p407_p1 = scmp.lt.s32.totalorder %s405_s24, %s400_s21 }
  0x2b   : > { %p404_p7 = pneg %p403_p5  ;;  %p408_p2 = por %p407_p1, %p406_p10 }
  0x2d   : > { %p409_p0 = pnand %p408_p2, %p404_p7 }
  0x2f   : > { %412 = shalt.err (!%p409_p0)
}
  0x30   : > { %s413_s27 = scalar_lea.vmem %s134_s14, 256  ;;  %s499_s30 = smov [#allocation2]  }
  0x31   : > { %p414_p3 = scmp.ne.s32.totalorder %s134_s14, %s413_s27  ;;  %s418_s3 = sshll.u32 %s499_s30, 4  ;;  %s419_s3 = int_to_ptr.vmem [resolvable:$false] %s418_s3 }
  0x32   : > { %s420_s4 = scalar_lea.vmem %s419_s3, 512  ;;  %p421_p12 = scmp.lt.s32.totalorder %s134_s14, %s419_s3 }
  0x33   : > { %p416_p6 = pnand %p414_p3, %p402_p13  ;;  %p422_p5 = scmp.lt.s32.totalorder %s420_s4, %s413_s27 }
  0x35   : > { %p417_p9 = pneg %p416_p6  ;;  %p423_p4 = por %p422_p5, %p421_p12 }
  0x37   : > { %p424_p8 = pnand %p423_p4, %p417_p9 }
  0x39   : > { %427 = shalt.err (!%p424_p8)
}
  0x3a   : > { %330 = dma.hbm_to_vmem [thread:$0]  (!%p614_p11), %s612_s7, 256, %s134_s14, %s122_s19  }
  0x3b   : > { %p703_p7 = scmp.ne.s32.totalorder %s697_s17, 0 }
  0x3c   : > { %s635_s5 = sand.u32 (!%p703_p7), 1, %s488_s10   ;;  %p704_p6 = scmp.ne.s32.totalorder (!%p703_p7), %s695_s15, 0 }
  0x3d   : > { %142 = sbr.rel (%p703_p7) target bundleno = 248 (0xf8), region = 28  ;;  %s305_s6 = sshll.u32 (!%p703_p7), %s635_s5, 4 }
  0x3e   : > { %s145_s8 = scalar_lea.sflag (!%p703_p7), [#allocation3], %s635_s5  ;;  %s148_s21 = scalar_lea.vmem (!%p703_p7), [#allocation2], %s305_s6 }
  0x42   : > { %471 = dma.done.wait (%p704_p6), %s145_s8, 256  }
  0x43   : > { %473 = vsyncadd (%p704_p6), %s145_s8, 4294967040  ;;  %p705_p4 = scmp.eq.s32.totalorder %s537_s13, 0 }
  0x45   : > { %475 = dma.done.wait (%p705_p4), [#allocation6], 32   ;;  %p706_p8 = pmov %p705_p4 }
  0x46   : > { %v173_v0 = vld [vmem:[%s148_s21] sm:$0xff]  ;;  %v174_v1 = vld [vmem:[%s148_s21 + $0x8] sm:$0xff]  ;;  %v188_v8 = vlaneseq  ;;  %s314_s15 = sshll.u32 %s537_s13, 8  ;;  %s172_s17 = scalar_lea.vmem [#allocation7], %s305_s6 }
  0x47   : > { %477 = vsyncadd (%p706_p8), [#allocation6], 4294967264  ;;  %v175_v2 = vmul.f32 %v173_v0, %v173_v0  ;;  %v176_v3 = vmul.f32 %v174_v1, %v174_v1  ;;  %v184_v12 = vld [vmem:[#allocation5] sm:$0x3]  ;;  %s217_s7 = sshll.u32 %s172_s17, 4  ;;  %s651_s19 = scalar_lea.hbm %s690_s2, %s314_s15  ;;  %s218_s7 = int_to_ptr.vmem [resolvable:$true] %s217_s7 }
  0x48   : > { %v189_v9 = vshrl.u32 %v188_v8, 7  ;;  %s203_s22 = scalar_lea.sflag [#allocation4], %s635_s5  ;;  %s428_s23 = scalar_lea.vmem %s218_s7, 256 }
  0x49   : > { %v177_v4 = vadd.f32 %v176_v3, %v175_v2  ;;  %p429_p9 = scmp.ne.s32.totalorder %s218_s7, %s428_s23  ;;  %p707_p11 = scmp.ne.s32.totalorder %s701_s29, 0 }
  0x4a   : > { %v190_v10 = vsub.s32 0, %v189_v9  ;;  %v194_v11 = vsub.s32 1, %v189_v9  ;;  %s500_s13 = smov [#allocation7]  }
  0x4b   : > { %178 = vadd.xlane.f32.xlu0 %v177_v4  ;;  %p430_p13 = pnand %p429_p9, %p707_p11  ;;  %s432_s24 = sshll.u32 %s500_s13, 4  ;;  %s433_s24 = int_to_ptr.vmem [resolvable:$false] %s432_s24 }
  0x4c   : > { %v191_v13 = vrot.slane %v184_v12, %v190_v10  ;;  %v195_v14 = vrot.slane %v184_v12, %v194_v11  ;;  %s434_s25 = scalar_lea.vmem %s433_s24, 512  ;;  %p435_p1 = scmp.lt.s32.totalorder %s218_s7, %s433_s24 }
  0x4d   : > { %p431_p10 = pneg %p430_p13  ;;  %p436_p2 = scmp.lt.s32.totalorder %s434_s25, %s428_s23 }
  0x4f   : > { %p437_p0 = por %p436_p2, %p435_p1 }
  0x51   : > { %p438_p3 = pnand %p437_p0, %p431_p10 }
  0xd4   : > { %v179_v5 = vpop.xlane.xlu0 %178 }
  0xd5   : > { %v181_v6 = vmul.f32 0.00390625, %v179_v5 }
  0xd7   : > { %v182_v7 = vadd.f32 1e-06, %v181_v6 }
  0xd9   : > { %372 = vrsqrt.f32 %v182_v7 }
  0xe6   : > { %v373_v15 = vpop.eup %372 }
  0xe7   : > { %v185_v16 = vmul.f32 %v373_v15, %v173_v0  ;;  %v186_v17 = vmul.f32 %v373_v15, %v174_v1 }
  0xe9   : > { %v198_v18 = vmul.f32 %v191_v13, %v185_v16  ;;  %v199_v19 = vmul.f32 %v195_v14, %v186_v17 }
  0xeb   : > { %200 = vst [vmem:[%s172_s17] sm:$0xff] %v198_v18  ;;  %201 = vst [vmem:[%s172_s17 + $0x8] sm:$0xff] %v199_v19 }
  0xec   : > { %441 = shalt.err (!%p438_p3)
}
  0xed   : > { %s442_s26 = scalar_lea.hbm %s651_s19, 256  ;;  %s446_s3 = scalar_lea.hbm %s690_s2, 512 }
  0xee   : > { %p443_p12 = scmp.ne.s32.totalorder %s651_s19, %s442_s26  ;;  %p447_p6 = scmp.lt.s32.totalorder %s651_s19, %s690_s2 }
  0xef   : > { %p448_p4 = scmp.lt.s32.totalorder %s446_s3, %s442_s26 }
  0xf0   : > { %p444_p5 = pnand %p443_p12, %p707_p11 }
  0xf1   : > { %p449_p8 = por %p448_p4, %p447_p6 }
  0xf2   : > { %p445_p7 = pneg %p444_p5 }
  0xf4   : > { %p450_p9 = pnand %p449_p8, %p445_p7 }
  0xf6   : > { %453 = shalt.err (!%p450_p9)
}
  0xf7   : > { %321 = dma.vmem_to_hbm [thread:$0]  (%p707_p11), %s218_s7, 256, %s651_s19, %s203_s22  }
  0xf8 PF: > { %s229_s6 = sand.u32 1, %s484_s9   ;;  %p708_p13 = scmp.ne.s32.totalorder %s696_s16, 0 }
  0xf9   : > { %p709_p10 = scmp.ge.s32.totalorder %s496_s12, 2  ;;  %s230_s8 = scalar_lea.sflag [#allocation4], %s229_s6 }
  0xfb   : > { %p332_p1 = pnand %p709_p10, %p708_p13 }
  0xfd   : > { %p333_p2 = pneg %p332_p1 }
  0xff   : > { %479 = dma.done.wait (%p333_p2), %s230_s8, 256  }
 0x100   : > { %481 = vsyncadd (%p333_p2), %s230_s8, 4294967040  ;;  %p16_p0 = scmp.ge.s32.totalorder %s564_s20, 4   ;;  %s710_s9 = smov %s488_s10 }
 0x101   : > { %s711_s10 = smov %s492_s11  ;;  %s712_s11 = smov %s591_s28 }
 0x102   : > { %s713_s12 = smov %s564_s20  ;;  %18 = sbr.rel (!%p16_p0) target bundleno = 6 (0x6), region = 77 }
 0x107   :  { %235 = vsyncpa [#allocation3], 1 }
 0x108   :  { %237 = vsyncpa [#allocation3 + $0x1], 1 }
 0x109   :  { %238 = vsyncpa [#allocation6], 1 }
 0x10a   :  { %239 = vsyncpa [#allocation4], 1 }
 0x10b   :  { %241 = vsyncpa [#allocation4 + $0x1], 1 }

</bundles_post_ra>
